<compile_context>
chip_gen: v7x
topology: tpu7x:2x2x1
jax: 0.10.0
libtpu: 0.0.40
codegen_flags: <defaults>
</compile_context>

<pallas_src>
import functools

import jax
import jax.numpy as jnp
from jax import lax
from jax.experimental import pallas as pl
from jax.experimental.pallas import tpu as pltpu


def _physical_vmem_bytes():
    """Best-effort per-core VMEM query; conservative 64 MiB (v7x) fallback."""
    try:
        info = pltpu.get_tpu_info()
        for attr in ("vmem_capacity_bytes", "vmem_size_bytes", "vmem_bytes"):
            v = getattr(info, attr, None)
            if v:
                return int(v)
    except Exception:
        pass
    return 64 * 1024 * 1024


def _pick_key_chunk(n):
    """Key/value chunk for the online softmax: full N when small, otherwise a
    ~512-row divisor so the (tq, kc) f32 score slab stays bounded."""
    if n <= 1024:
        return n
    for kc in (512, 1024, 384, 256, 128, 64):
        if n % kc == 0:
            return kc
    return n


def _q_tile_candidates(n):
    cands = []
    if n <= 512:
        cands.append(n)
    for t in (512, 384, 256, 128, 64, 32, 16, 8):
        if t <= n and n % t == 0 and t not in cands:
            cands.append(t)
    if not cands:
        cands.append(n)
    return cands


def _estimate_vmem(tq, kc, N, D, heads, dh, out_bytes):
    """Honest working-set estimate (already counts double-buffering once)."""
    inner = heads * dh
    return (2 * N * D * 2               # x block (bf16), double-buffered
            + 2 * tq * D * out_bytes    # output block, double-buffered
            + 2 * 4 * D * inner * 2     # resident wq/wk/wv/wo (bf16), 2 bufs each
            + 2 * heads * N * dh * 2    # normalized-K / V caches (bf16)
            + tq * D * 4                # head-reduction accumulator (f32)
            + 2 * N * dh * 4            # per-head K/V fill intermediates (f32)
            + 3 * tq * kc * 4           # score / prob chunk temporaries (f32)
            + 4 * tq * dh * 4           # q / qn / acc / o_h (f32)
            + 2 * D * 4)                # bias


def _attn_kernel(temp_ref, x_ref, wq_ref, wk_ref, wv_ref, wo_ref, bout_ref,
                 o_ref, kn_cache, v_cache, y_acc, *, heads, dim_head, tq, kc,
                 seq_len):
    # temp_ref : (heads,)          SMEM  per-head softmax temperature (f32)
    # x_ref    : (1, N, D)         VMEM  bf16, full sequence for this batch
    # wq/wk/wv : (heads, D, dh)    VMEM  bf16, resident for the whole grid
    # wo_ref   : (heads, dh, D)    VMEM  bf16, resident for the whole grid
    # bout_ref : (1, D)            VMEM  f32
    # o_ref    : (1, tq, D)        VMEM  output block (written at last head)
    # kn_cache : (heads, N, dh)    VMEM  bf16 scratch (normalized K per head)
    # v_cache  : (heads, N, dh)    VMEM  bf16 scratch
    # y_acc    : (tq, D)           VMEM  f32 scratch, accumulated across heads
    i = pl.program_id(1)          # query-tile index
    h = pl.program_id(2)          # head index (reduction axis, innermost)
    dh = dim_head
    eps = 1e-12

    @pl.when(h == 0)
    def _():
        y_acc[...] = jnp.zeros_like(y_acc)

    # Per-(batch, head) K/V projection + L2 norm: computed once at the first
    # query tile and cached for all remaining tiles of this batch.
    @pl.when(i == 0)
    def _():
        x = x_ref[0]                                                    # (N, D)
        k = jnp.dot(x, wk_ref[h], preferred_element_type=jnp.float32)  # (N, dh)
        v = jnp.dot(x, wv_ref[h], preferred_element_type=jnp.float32)  # (N, dh)
        k_scale = lax.rsqrt(
            jnp.maximum(jnp.sum(k * k, axis=-1, keepdims=True), eps * eps))
        kn_cache[h] = (k * k_scale).astype(jnp.bfloat16)
        v_cache[h] = v.astype(jnp.bfloat16)

    # Q projection for this query tile / head (bf16 MXU, f32 accumulation).
    if tq % 128 == 0:
        row0 = pl.multiple_of(i * tq, 128)
    elif tq % 8 == 0:
        row0 = pl.multiple_of(i * tq, 8)
    else:
        row0 = i * tq
    xq = x_ref[0, pl.ds(row0, tq), :]                                   # (tq, D)
    q = jnp.dot(xq, wq_ref[h], preferred_element_type=jnp.float32)      # (tq, dh)
    # F.normalize(dim=-1, eps=1e-12) via rsqrt (EUP); fold the temperature into
    # the per-row q scale (O(tq) multiplies instead of O(tq*N) on the scores).
    q_scale = lax.rsqrt(
        jnp.maximum(jnp.sum(q * q, axis=-1, keepdims=True), eps * eps))
    qn = (q * (q_scale * temp_ref[h])).astype(jnp.bfloat16)

    # Flash-style online softmax over key/value chunks (static loop; a single
    # chunk for small N).  No kn transpose: contract dh against dh directly.
    dn = (((1,), (1,)), ((), ()))
    num_chunks = seq_len // kc
    m = l = acc = None
    for c in range(num_chunks):
        kn_c = kn_cache[h, pl.ds(c * kc, kc), :]                        # (kc, dh)
        v_c = v_cache[h, pl.ds(c * kc, kc), :]                          # (kc, dh)
        s = lax.dot_general(qn, kn_c, dn,
                            preferred_element_type=jnp.float32)         # (tq, kc)
        c_max = jnp.max(s, axis=-1, keepdims=True)
        if c == 0:
            m = c_max
            p = jnp.exp(s - m)
            l = jnp.sum(p, axis=-1, keepdims=True)
            acc = jnp.dot(p.astype(jnp.bfloat16), v_c,
                          preferred_element_type=jnp.float32)           # (tq, dh)
        else:
            m_new = jnp.maximum(m, c_max)
            alpha = jnp.exp(m - m_new)
            p = jnp.exp(s - m_new)
            l = alpha * l + jnp.sum(p, axis=-1, keepdims=True)
            acc = alpha * acc + jnp.dot(p.astype(jnp.bfloat16), v_c,
                                        preferred_element_type=jnp.float32)
            m = m_new

    # Softmax denominator applied after the PV matmul: O(tq*dh) instead of
    # scaling the full (tq, N) probability matrix.
    o_h = acc * pl.reciprocal(l, approx=True)                           # (tq, dh)

    # Fold this head's slice of W_out straight into the accumulator.
    y_acc[...] += jnp.dot(o_h.astype(jnp.bfloat16), wo_ref[h],
                          preferred_element_type=jnp.float32)           # (tq, D)

    @pl.when(h == heads - 1)
    def _():
        o_ref[0] = (y_acc[...] + bout_ref[...]).astype(o_ref.dtype)


def attn_norm_forward(x, w_qkv, w_out, b_out, softmax_temp, *, heads, dim_head,
                      q_tile=None, key_chunk=None):
    """x: (B, N, D).  w_qkv: (D, 3*inner).  w_out: (inner, D).  b_out: (D,).
    softmax_temp: (heads,)."""
    B, N, D = x.shape
    dh = dim_head
    inner = heads * dh
    assert w_qkv.shape == (D, 3 * inner)
    assert w_out.shape == (inner, D)
    assert softmax_temp.shape == (heads,)

    out_bytes = jnp.dtype(x.dtype).itemsize

    # Generation-aware VMEM policy: budget ~85% of physical VMEM; choose the
    # largest query tile whose working set fits.
    budget = int(_physical_vmem_bytes() * 0.85)
    kc = key_chunk if key_chunk is not None else _pick_key_chunk(N)
    if q_tile is not None:
        tq = q_tile
    else:
        cands = _q_tile_candidates(N)
        tq = cands[-1]
        for t in cands:
            if _estimate_vmem(t, kc, N, D, heads, dh, out_bytes) <= budget:
                tq = t
                break
    assert N % tq == 0 and N % kc == 0
    num_q_tiles = N // tq

    # Lane-aligned per-head weight layouts; bf16 for the MXU fast path and
    # halved HBM/VMEM traffic.  Column order of w_qkv is [q | k | v], each
    # head-major, matching torch's qkv split + per-head reshape.
    wq = w_qkv[:, 0 * inner:1 * inner].reshape(D, heads, dh).transpose(1, 0, 2)
    wk = w_qkv[:, 1 * inner:2 * inner].reshape(D, heads, dh).transpose(1, 0, 2)
    wv = w_qkv[:, 2 * inner:3 * inner].reshape(D, heads, dh).transpose(1, 0, 2)
    wo = w_out.reshape(heads, dh, D)

    x_bf = x.astype(jnp.bfloat16)
    wq, wk, wv, wo = (t.astype(jnp.bfloat16) for t in (wq, wk, wv, wo))

    kernel = functools.partial(_attn_kernel, heads=heads, dim_head=dh, tq=tq,
                               kc=kc, seq_len=N)

    return pl.pallas_call(
        kernel,
        out_shape=jax.ShapeDtypeStruct((B, N, D), x.dtype),
        grid_spec=pltpu.PrefetchScalarGridSpec(
            num_scalar_prefetch=0,
            grid=(B, num_q_tiles, heads),
            in_specs=[
                pl.BlockSpec(memory_space=pltpu.MemorySpace.SMEM),        # temp
                pl.BlockSpec((1, N, D), lambda b, i, h: (b, 0, 0)),       # x (full seq)
                pl.BlockSpec((heads, D, dh), lambda b, i, h: (0, 0, 0)),  # wq (resident)
                pl.BlockSpec((heads, D, dh), lambda b, i, h: (0, 0, 0)),  # wk (resident)
                pl.BlockSpec((heads, D, dh), lambda b, i, h: (0, 0, 0)),  # wv (resident)
                pl.BlockSpec((heads, dh, D), lambda b, i, h: (0, 0, 0)),  # wo (resident)
                pl.BlockSpec((1, D), lambda b, i, h: (0, 0)),             # b_out
            ],
            out_specs=pl.BlockSpec((1, tq, D), lambda b, i, h: (b, i, 0)),
            scratch_shapes=[
                pltpu.VMEM((heads, N, dh), jnp.bfloat16),   # normalized-K cache
                pltpu.VMEM((heads, N, dh), jnp.bfloat16),   # V cache
                pltpu.VMEM((tq, D), jnp.float32),           # head-reduction acc
            ],
        ),
        compiler_params=pltpu.CompilerParams(
            # The query-tile axis must stay "arbitrary": the K/V cache is
            # filled at i == 0 and reused for i > 0, which requires in-order
            # iteration on a single core.  Batch stays "parallel" (megacore).
            dimension_semantics=("parallel", "arbitrary", "arbitrary"),
            vmem_limit_bytes=budget,
        ),
    )(softmax_temp.astype(jnp.float32), x_bf, wq, wk, wv, wo,
      b_out.reshape(1, D).astype(jnp.float32))


def _reference(x, w_qkv, w_out, b_out, softmax_temp, *, heads, dim_head):
    B, N, D = x.shape
    inner = heads * dim_head
    qkv = x @ w_qkv
    q, k, v = jnp.split(qkv, 3, axis=-1)

    def split_heads(t):
        return t.reshape(B, N, heads, dim_head).transpose(0, 2, 1, 3)

    q, k, v = map(split_heads, (q, k, v))
    qn = q / jnp.maximum(jnp.linalg.norm(q, axis=-1, keepdims=True), 1e-12)
    kn = k / jnp.maximum(jnp.linalg.norm(k, axis=-1, keepdims=True), 1e-12)
    s = jnp.einsum("bhqd,bhkd->bhqk", qn, kn) * softmax_temp[None, :, None, None]
    p = jax.nn.softmax(s, axis=-1)
    o = jnp.einsum("bhqk,bhkd->bhqd", p, v)
    o = o.transpose(0, 2, 1, 3).reshape(B, N, inner)
    return o @ w_out + b_out[None, None, :]


def _run_case(key, B, N, dim, heads, dim_head, q_tile=None, key_chunk=None):
    inner = heads * dim_head
    k1, k2, k3, k4 = jax.random.split(key, 4)
    x = jax.random.normal(k1, (B, N, dim), dtype=jnp.float32)
    w_qkv = jax.random.normal(k2, (dim, 3 * inner), dtype=jnp.float32) * 0.05
    w_out = jax.random.normal(k3, (inner, dim), dtype=jnp.float32) * 0.05
    b_out = jax.random.normal(k4, (dim,), dtype=jnp.float32) * 0.01
    softmax_temp = jnp.ones((heads,), dtype=jnp.float32) * 10.0

    out = attn_norm_forward(x, w_qkv, w_out, b_out, softmax_temp,
                            heads=heads, dim_head=dim_head,
                            q_tile=q_tile, key_chunk=key_chunk)
    out = jax.block_until_ready(out)
    ref = _reference(x, w_qkv, w_out, b_out, softmax_temp,
                     heads=heads, dim_head=dim_head)
    assert out.shape == (B, N, dim)
    # bf16 MXU operands + approx reciprocal (f32 accumulation) -> loosened
    # tolerance vs the f32 reference.
    assert jnp.allclose(out, ref, atol=3e-2, rtol=3e-2), "mismatch vs reference"


if __name__ == "__main__":
    key = jax.random.PRNGKey(0)
    k_a, k_b = jax.random.split(key)

    # Small shapes consistent with the module defaults (heads=8, dim_head=64).
    _run_case(k_a, B=2, N=8, dim=32, heads=8, dim_head=64)

    # Second case forces multiple query tiles and multiple key chunks to
    # exercise the K/V cache reuse (i > 0) and online-softmax (c > 0) paths.
    _run_case(k_b, B=1, N=256, dim=128, heads=4, dim_head=64,
              q_tile=128, key_chunk=128)

    print("KERNEL_OK")
</pallas_src>

<mosaic_0001>
module attributes {stable_mosaic.version = 11 : i64} {
  func.func @_attn_kernel(%arg0: i32, %arg1: i32, %arg2: i32, %arg3: memref<8xf32, #tpu.memory_space<smem>>, %arg4: memref<1x8x32xbf16, #tpu.memory_space<vmem>>, %arg5: memref<8x32x64xbf16, #tpu.memory_space<vmem>>, %arg6: memref<8x32x64xbf16, #tpu.memory_space<vmem>>, %arg7: memref<8x32x64xbf16, #tpu.memory_space<vmem>>, %arg8: memref<8x64x32xbf16, #tpu.memory_space<vmem>>, %arg9: memref<1x32xf32, #tpu.memory_space<vmem>>, %arg10: memref<1x8x32xf32, #tpu.memory_space<vmem>>, %arg11: memref<8x8x64xbf16, #tpu.memory_space<vmem>>, %arg12: memref<8x8x64xbf16, #tpu.memory_space<vmem>>, %arg13: memref<8x32xf32, #tpu.memory_space<vmem>>) attributes {dimension_semantics = [#tpu.dimension_semantics<parallel>, #tpu.dimension_semantics<arbitrary>, #tpu.dimension_semantics<arbitrary>], iteration_bounds = array<i64: 2, 1, 8>, scalar_prefetch = 0 : i64, scratch_operands = 3 : i64, tpu.core_type = #tpu.core_type<tc>, window_params = [{transform_indices = @transform_0, window_bounds = array<i64: 8>}, {transform_indices = @transform_1, window_bounds = array<i64: 1, 8, 32>}, {pipeline_mode = #tpu.pipeline_mode<synchronous>, transform_indices = @transform_2, window_bounds = array<i64: 8, 32, 64>}, {pipeline_mode = #tpu.pipeline_mode<synchronous>, transform_indices = @transform_3, window_bounds = array<i64: 8, 32, 64>}, {pipeline_mode = #tpu.pipeline_mode<synchronous>, transform_indices = @transform_4, window_bounds = array<i64: 8, 32, 64>}, {pipeline_mode = #tpu.pipeline_mode<synchronous>, transform_indices = @transform_5, window_bounds = array<i64: 8, 64, 32>}, {pipeline_mode = #tpu.pipeline_mode<synchronous>, transform_indices = @transform_6, window_bounds = array<i64: 1, 32>}, {transform_indices = @transform_7, window_bounds = array<i64: 1, 8, 32>}]} {
    %c0_i32 = arith.constant 0 : i32
    %0 = arith.cmpi eq, %arg2, %c0_i32 : i32
    %1 = arith.extui %0 : i1 to i32
    %c0_i32_0 = arith.constant 0 : i32
    %2 = arith.cmpi ne, %1, %c0_i32_0 : i32
    scf.if %2 {
      %cst_24 = arith.constant 0.000000e+00 : f32
      %58 = vector.broadcast %cst_24 : f32 to vector<8x32xf32>
      %c0_25 = arith.constant 0 : index
      %c0_26 = arith.constant 0 : index
      %59 = vector.load %arg13[%c0_25, %c0_26] : memref<8x32xf32, #tpu.memory_space<vmem>>, vector<8x32xf32>
      tpu.vector_store %arg13[%c0_25, %c0_26], %58 {strides = array<i32>} : memref<8x32xf32, #tpu.memory_space<vmem>>, vector<8x32xf32>,
    } else {
    }
    %c0_i32_1 = arith.constant 0 : i32
    %3 = arith.cmpi eq, %arg1, %c0_i32_1 : i32
    %4 = arith.extui %3 : i1 to i32
    %c0_i32_2 = arith.constant 0 : i32
    %5 = arith.cmpi ne, %4, %c0_i32_2 : i32
    scf.if %5 {
      %c0_24 = arith.constant 0 : index
      %c0_25 = arith.constant 0 : index
      %c0_26 = arith.constant 0 : index
      %58 = vector.load %arg4[%c0_24, %c0_25, %c0_26] : memref<1x8x32xbf16, #tpu.memory_space<vmem>>, vector<1x8x32xbf16>
      %59 = vector.shape_cast %58 : vector<1x8x32xbf16> to vector<8x32xbf16>
      %60 = arith.index_cast %arg2 : i32 to index
      %c0_27 = arith.constant 0 : index
      %c0_28 = arith.constant 0 : index
      %61 = vector.load %arg6[%60, %c0_27, %c0_28] : memref<8x32x64xbf16, #tpu.memory_space<vmem>>, vector<1x32x64xbf16>
      %62 = vector.shape_cast %61 : vector<1x32x64xbf16> to vector<32x64xbf16>
      %cst_29 = arith.constant dense<0.000000e+00> : vector<8x64xf32>
      %63 = tpu.matmul %59, %62, %cst_29 {dimension_numbers = #tpu.dot_dimension_numbers<[1], [0], [0], [1], [0, 0, 1, 1], [], []>} : vector<8x32xbf16>, vector<32x64xbf16>, vector<8x64xf32> -> vector<8x64xf32>
      %64 = arith.index_cast %arg2 : i32 to index
      %c0_30 = arith.constant 0 : index
      %c0_31 = arith.constant 0 : index
      %65 = vector.load %arg7[%64, %c0_30, %c0_31] : memref<8x32x64xbf16, #tpu.memory_space<vmem>>, vector<1x32x64xbf16>
      %66 = vector.shape_cast %65 : vector<1x32x64xbf16> to vector<32x64xbf16>
      %cst_32 = arith.constant dense<0.000000e+00> : vector<8x64xf32>
      %67 = tpu.matmul %59, %66, %cst_32 {dimension_numbers = #tpu.dot_dimension_numbers<[1], [0], [0], [1], [0, 0, 1, 1], [], []>} : vector<8x32xbf16>, vector<32x64xbf16>, vector<8x64xf32> -> vector<8x64xf32>
      %68 = arith.mulf %63, %63 : vector<8x64xf32>
      %cst_33 = arith.constant dense<0.000000e+00> : vector<8xf32>
      %69 = vector.multi_reduction <add>, %68, %cst_33 [1] : vector<8x64xf32> to vector<8xf32>
      %70 = vector.shape_cast %69 : vector<8xf32> to vector<8x1xf32>
      %cst_34 = arith.constant 1.000000e-24 : f32
      %71 = vector.broadcast %cst_34 : f32 to vector<8x1xf32>
      %72 = arith.maximumf %70, %71 : vector<8x1xf32>
      %73 = math.rsqrt %72 : vector<8x1xf32>
      %74 = vector.broadcast %73 : vector<8x1xf32> to vector<8x64xf32>
      %75 = arith.mulf %63, %74 : vector<8x64xf32>
      %76 = arith.truncf %75 : vector<8x64xf32> to vector<8x64xbf16>
      %77 = arith.index_cast %arg2 : i32 to index
      %c0_35 = arith.constant 0 : index
      %c0_36 = arith.constant 0 : index
      %78 = vector.load %arg11[%77, %c0_35, %c0_36] : memref<8x8x64xbf16, #tpu.memory_space<vmem>>, vector<1x8x64xbf16>
      %79 = vector.shape_cast %78 : vector<1x8x64xbf16> to vector<8x64xbf16>
      %80 = vector.shape_cast %76 : vector<8x64xbf16> to vector<1x8x64xbf16>
      tpu.vector_store %arg11[%77, %c0_35, %c0_36], %80 {strides = array<i32>} : memref<8x8x64xbf16, #tpu.memory_space<vmem>>, vector<1x8x64xbf16>,
      %81 = arith.truncf %67 : vector<8x64xf32> to vector<8x64xbf16>
      %82 = arith.index_cast %arg2 : i32 to index
      %c0_37 = arith.constant 0 : index
      %c0_38 = arith.constant 0 : index
      %83 = vector.load %arg12[%82, %c0_37, %c0_38] : memref<8x8x64xbf16, #tpu.memory_space<vmem>>, vector<1x8x64xbf16>
      %84 = vector.shape_cast %83 : vector<1x8x64xbf16> to vector<8x64xbf16>
      %85 = vector.shape_cast %81 : vector<8x64xbf16> to vector<1x8x64xbf16>
      tpu.vector_store %arg12[%82, %c0_37, %c0_38], %85 {strides = array<i32>} : memref<8x8x64xbf16, #tpu.memory_space<vmem>>, vector<1x8x64xbf16>,
    } else {
    }
    %c8_i32 = arith.constant 8 : i32
    %6 = arith.muli %arg1, %c8_i32 : i32
    %7 = tpu.assume_multiple %6, 8 : i32
    %c0 = arith.constant 0 : index
    %8 = arith.index_cast %7 : i32 to index
    %c0_3 = arith.constant 0 : index
    %9 = vector.load %arg4[%c0, %8, %c0_3] : memref<1x8x32xbf16, #tpu.memory_space<vmem>>, vector<1x8x32xbf16>
    %10 = vector.shape_cast %9 : vector<1x8x32xbf16> to vector<8x32xbf16>
    %11 = arith.index_cast %arg2 : i32 to index
    %c0_4 = arith.constant 0 : index
    %c0_5 = arith.constant 0 : index
    %12 = vector.load %arg5[%11, %c0_4, %c0_5] : memref<8x32x64xbf16, #tpu.memory_space<vmem>>, vector<1x32x64xbf16>
    %13 = vector.shape_cast %12 : vector<1x32x64xbf16> to vector<32x64xbf16>
    %cst = arith.constant dense<0.000000e+00> : vector<8x64xf32>
    %14 = tpu.matmul %10, %13, %cst {dimension_numbers = #tpu.dot_dimension_numbers<[1], [0], [0], [1], [0, 0, 1, 1], [], []>} : vector<8x32xbf16>, vector<32x64xbf16>, vector<8x64xf32> -> vector<8x64xf32>
    %15 = arith.mulf %14, %14 : vector<8x64xf32>
    %cst_6 = arith.constant dense<0.000000e+00> : vector<8xf32>
    %16 = vector.multi_reduction <add>, %15, %cst_6 [1] : vector<8x64xf32> to vector<8xf32>
    %17 = vector.shape_cast %16 : vector<8xf32> to vector<8x1xf32>
    %cst_7 = arith.constant 1.000000e-24 : f32
    %18 = vector.broadcast %cst_7 : f32 to vector<8x1xf32>
    %19 = arith.maximumf %17, %18 : vector<8x1xf32>
    %20 = math.rsqrt %19 : vector<8x1xf32>
    %21 = arith.index_cast %arg2 : i32 to index
    %22 = memref.load %arg3[%21] : memref<8xf32, #tpu.memory_space<smem>>
    %23 = vector.broadcast %22 : f32 to vector<8x1xf32>
    %24 = arith.mulf %20, %23 : vector<8x1xf32>
    %25 = vector.broadcast %24 : vector<8x1xf32> to vector<8x64xf32>
    %26 = arith.mulf %14, %25 : vector<8x64xf32>
    %27 = arith.truncf %26 : vector<8x64xf32> to vector<8x64xbf16>
    %28 = arith.index_cast %arg2 : i32 to index
    %c0_8 = arith.constant 0 : index
    %c0_9 = arith.constant 0 : index
    %29 = vector.load %arg11[%28, %c0_8, %c0_9] : memref<8x8x64xbf16, #tpu.memory_space<vmem>>, vector<1x8x64xbf16>
    %30 = vector.shape_cast %29 : vector<1x8x64xbf16> to vector<8x64xbf16>
    %31 = arith.index_cast %arg2 : i32 to index
    %c0_10 = arith.constant 0 : index
    %c0_11 = arith.constant 0 : index
    %32 = vector.load %arg12[%31, %c0_10, %c0_11] : memref<8x8x64xbf16, #tpu.memory_space<vmem>>, vector<1x8x64xbf16>
    %33 = vector.shape_cast %32 : vector<1x8x64xbf16> to vector<8x64xbf16>
    %cst_12 = arith.constant dense<0.000000e+00> : vector<8x8xf32>
    %34 = tpu.matmul %27, %30, %cst_12 {dimension_numbers = #tpu.dot_dimension_numbers<[1], [1], [0], [0], [0, 0, 1, 0], [], []>} : vector<8x64xbf16>, vector<8x64xbf16>, vector<8x8xf32> -> vector<8x8xf32>
    %cst_13 = arith.constant dense<0xFF800000> : vector<8xf32>
    %35 = vector.multi_reduction <maximumf>, %34, %cst_13 [1] : vector<8x8xf32> to vector<8xf32>
    %36 = vector.shape_cast %35 : vector<8xf32> to vector<8x1xf32>
    %37 = vector.broadcast %36 : vector<8x1xf32> to vector<8x8xf32>
    %38 = arith.subf %34, %37 : vector<8x8xf32>
    %39 = math.exp %38 : vector<8x8xf32>
    %cst_14 = arith.constant dense<0.000000e+00> : vector<8xf32>
    %40 = vector.multi_reduction <add>, %39, %cst_14 [1] : vector<8x8xf32> to vector<8xf32>
    %41 = vector.shape_cast %40 : vector<8xf32> to vector<8x1xf32>
    %42 = arith.truncf %39 : vector<8x8xf32> to vector<8x8xbf16>
    %cst_15 = arith.constant dense<0.000000e+00> : vector<8x64xf32>
    %43 = tpu.matmul %42, %33, %cst_15 {dimension_numbers = #tpu.dot_dimension_numbers<[1], [0], [0], [1], [0, 0, 1, 1], [], []>} : vector<8x8xbf16>, vector<8x64xbf16>, vector<8x64xf32> -> vector<8x64xf32>
    %44 = tpu.reciprocal %41 {approx = true} : vector<8x1xf32> -> vector<8x1xf32>
    %45 = vector.broadcast %44 : vector<8x1xf32> to vector<8x64xf32>
    %46 = arith.mulf %43, %45 : vector<8x64xf32>
    %c0_16 = arith.constant 0 : index
    %c0_17 = arith.constant 0 : index
    %47 = vector.load %arg13[%c0_16, %c0_17] : memref<8x32xf32, #tpu.memory_space<vmem>>, vector<8x32xf32>
    %48 = arith.truncf %46 : vector<8x64xf32> to vector<8x64xbf16>
    %49 = arith.index_cast %arg2 : i32 to index
    %c0_18 = arith.constant 0 : index
    %c0_19 = arith.constant 0 : index
    %50 = vector.load %arg8[%49, %c0_18, %c0_19] : memref<8x64x32xbf16, #tpu.memory_space<vmem>>, vector<1x64x32xbf16>
    %51 = vector.shape_cast %50 : vector<1x64x32xbf16> to vector<64x32xbf16>
    %cst_20 = arith.constant dense<0.000000e+00> : vector<8x32xf32>
    %52 = tpu.matmul %48, %51, %cst_20 {dimension_numbers = #tpu.dot_dimension_numbers<[1], [0], [0], [1], [0, 0, 1, 1], [], []>} : vector<8x64xbf16>, vector<64x32xbf16>, vector<8x32xf32> -> vector<8x32xf32>
    %53 = arith.addf %47, %52 : vector<8x32xf32>
    %c0_21 = arith.constant 0 : index
    %c0_22 = arith.constant 0 : index
    %54 = vector.load %arg13[%c0_21, %c0_22] : memref<8x32xf32, #tpu.memory_space<vmem>>, vector<8x32xf32>
    tpu.vector_store %arg13[%c0_21, %c0_22], %53 {strides = array<i32>} : memref<8x32xf32, #tpu.memory_space<vmem>>, vector<8x32xf32>,
    %c7_i32 = arith.constant 7 : i32
    %55 = arith.cmpi eq, %arg2, %c7_i32 : i32
    %56 = arith.extui %55 : i1 to i32
    %c0_i32_23 = arith.constant 0 : i32
    %57 = arith.cmpi ne, %56, %c0_i32_23 : i32
    scf.if %57 {
      %c0_24 = arith.constant 0 : index
      %c0_25 = arith.constant 0 : index
      %58 = vector.load %arg13[%c0_24, %c0_25] : memref<8x32xf32, #tpu.memory_space<vmem>>, vector<8x32xf32>
      %c0_26 = arith.constant 0 : index
      %c0_27 = arith.constant 0 : index
      %59 = vector.load %arg9[%c0_26, %c0_27] : memref<1x32xf32, #tpu.memory_space<vmem>>, vector<1x32xf32>
      %60 = vector.broadcast %59 : vector<1x32xf32> to vector<8x32xf32>
      %61 = arith.addf %58, %60 : vector<8x32xf32>
      %c0_28 = arith.constant 0 : index
      %c0_29 = arith.constant 0 : index
      %c0_30 = arith.constant 0 : index
      %62 = vector.load %arg10[%c0_28, %c0_29, %c0_30] : memref<1x8x32xf32, #tpu.memory_space<vmem>>, vector<1x8x32xf32>
      %63 = vector.shape_cast %62 : vector<1x8x32xf32> to vector<8x32xf32>
      %64 = vector.shape_cast %61 : vector<8x32xf32> to vector<1x8x32xf32>
      tpu.vector_store %arg10[%c0_28, %c0_29, %c0_30], %64 {strides = array<i32>} : memref<1x8x32xf32, #tpu.memory_space<vmem>>, vector<1x8x32xf32>,
    } else {
    }
    return
  }
  func.func @transform_0(%arg0: i32, %arg1: i32, %arg2: i32) -> i32 {
    %c0_i32 = arith.constant 0 : i32
    %c0_i32_0 = arith.constant 0 : i32
    return %c0_i32 : i32
  }
  func.func @transform_1(%arg0: i32, %arg1: i32, %arg2: i32) -> (i32, i32, i32) {
    %c0_i32 = arith.constant 0 : i32
    %c0_i32_0 = arith.constant 0 : i32
    %c0_i32_1 = arith.constant 0 : i32
    return %arg0, %c0_i32, %c0_i32_0 : i32, i32, i32
  }
  func.func @transform_2(%arg0: i32, %arg1: i32, %arg2: i32) -> (i32, i32, i32) {
    %c0_i32 = arith.constant 0 : i32
    %c0_i32_0 = arith.constant 0 : i32
    %c0_i32_1 = arith.constant 0 : i32
    %c0_i32_2 = arith.constant 0 : i32
    return %c0_i32, %c0_i32_0, %c0_i32_1 : i32, i32, i32
  }
  func.func @transform_3(%arg0: i32, %arg1: i32, %arg2: i32) -> (i32, i32, i32) {
    %c0_i32 = arith.constant 0 : i32
    %c0_i32_0 = arith.constant 0 : i32
    %c0_i32_1 = arith.constant 0 : i32
    %c0_i32_2 = arith.constant 0 : i32
    return %c0_i32, %c0_i32_0, %c0_i32_1 : i32, i32, i32
  }
  func.func @transform_4(%arg0: i32, %arg1: i32, %arg2: i32) -> (i32, i32, i32) {
    %c0_i32 = arith.constant 0 : i32
    %c0_i32_0 = arith.constant 0 : i32
    %c0_i32_1 = arith.constant 0 : i32
    %c0_i32_2 = arith.constant 0 : i32
    return %c0_i32, %c0_i32_0, %c0_i32_1 : i32, i32, i32
  }
  func.func @transform_5(%arg0: i32, %arg1: i32, %arg2: i32) -> (i32, i32, i32) {
    %c0_i32 = arith.constant 0 : i32
    %c0_i32_0 = arith.constant 0 : i32
    %c0_i32_1 = arith.constant 0 : i32
    %c0_i32_2 = arith.constant 0 : i32
    return %c0_i32, %c0_i32_0, %c0_i32_1 : i32, i32, i32
  }
  func.func @transform_6(%arg0: i32, %arg1: i32, %arg2: i32) -> (i32, i32) {
    %c0_i32 = arith.constant 0 : i32
    %c0_i32_0 = arith.constant 0 : i32
    %c0_i32_1 = arith.constant 0 : i32
    return %c0_i32, %c0_i32_0 : i32, i32
  }
  func.func @transform_7(%arg0: i32, %arg1: i32, %arg2: i32) -> (i32, i32, i32) {
    %c0_i32 = arith.constant 0 : i32
    %c0_i32_0 = arith.constant 0 : i32
    return %arg0, %arg1, %c0_i32 : i32, i32, i32
  }
}

</mosaic_0001>

<bundles_post_ra>
// kernel: tpu_custom_call.1
= control target key start
LH: loop header
LB: loop body
LE: loop exit
PB: predicated region body
PF: predicated region fallthrough
CT: control target
= control target key end

     0   :  { %s1599_s0 = inlined_call_operand.hbm [shape: f32[8], index: 0, kind: input, shape index: {}]   ;;  %s1600_s1 = inlined_call_operand.hbm [shape: bf16[2,8,32], index: 1, kind: input, shape index: {}]   ;;  %s1601_s2 = inlined_call_operand.vmem [shape: bf16[8,32,64], index: 2, kind: input, shape index: {}]   ;;  %s1602_s3 = inlined_call_operand.vmem [shape: bf16[8,32,64], index: 3, kind: input, shape index: {}]   ;;  %s1603_s4 = inlined_call_operand.vmem [shape: bf16[8,32,64], index: 4, kind: input, shape index: {}]   ;;  %s1604_s5 = inlined_call_operand.vmem [shape: bf16[8,64,32], index: 5, kind: input, shape index: {}]   ;;  %s1605_s6 = inlined_call_operand.vmem [shape: f32[1,32], index: 6, kind: input, shape index: {}]   ;;  %s1606_s7 = inlined_call_operand.hbm [shape: f32[2,8,32], index: 7, kind: output, shape index: {}]  }
   0x1   :  { %1614 = sst [smem:[#allocation17_spill]] %s1599_s0 }
   0x2   :  { %12 = vsyncpa [#allocation8], 0 }
   0x3   :  { %13 = vsyncpa [#allocation6], 0 }
   0x4   :  { %15 = vsyncpa [#allocation6 + $0x1], 0 }
   0x5   :  { %16 = vsyncpa [#allocation7], 0 }
   0x6   :  { %18 = vsyncpa [#allocation7 + $0x1], 0  ;;  %s1314_s24 = smov 0   ;;  %s1316_s25 = smov 0  }
   0x7   :  { %s1318_s26 = smov 0   ;;  %s1320_s27 = smov 0  }
   0x8   :  { %s1322_s28 = smov 0   ;;  %s1324_s29 = smov 0  }
   0x9   :  { %s1326_s30 = smov 0   ;;  %s1328_s8 = smov 0  }
   0xa LB: > { %1615 = sst [smem:[#allocation14_spill]] %s1258_s29  ;;  %s896_s9 = sadd.s32 4294967295, %s1266_s8   ;;  %s1266_s8 = sphi %s1328_s8, %s24_s8   ;;  %s1262_s30 = sphi %s1326_s30, %s1638_s30   ;;  %s1258_s29 = sphi %s1324_s29, %s1637_s29   ;;  %s1254_s28 = sphi %s1322_s28, %s1636_s28   ;;  %s1250_s27 = sphi %s1320_s27, %s1631_s27   ;;  %s1246_s26 = sphi %s1318_s26, %s1635_s26   ;;  %s1242_s25 = sphi %s1316_s25, %s1634_s25   ;;  %s1238_s24 = sphi %s1314_s24, %s1633_s24  }
   0xb   : > { %s897_s10 = sadd.s32 4294967294, %s1266_s8   ;;  %p84_p0 = scmp.ne.s32.totalorder %s1242_s25, %s1238_s24 }
   0xc   : > { %p1358_p1 = scmp.eq.s32.totalorder %s896_s9, 0  ;;  %p1362_p2 = scmp.eq.s32.totalorder %s896_s9, 15 }
   0xd   : > { %p221_p3 = scmp.eq.s32.totalorder %s897_s10, 15  ;;  %p898_p5 = scmp.ge.s32.totalorder %s1266_s8, 1 }
   0xe   : > { %s1616_s11 = scalar_select %p1358_p1, 1, 0 }
   0xf   : > { %p1368_p4 = por %p1358_p1, %p84_p0  ;;  %p1373_p6 = por %p221_p3, %p84_p0 }
  0x10   : > { %p228_p7 = scmp.lt.s32.totalorder %s1266_s8, 17  ;;  %s36_s16 = sadd.s32 1, %s1258_s29 }
  0x11   : > { %s1618_s13 = scalar_select %p1368_p4, 1, 0 }
  0x12   : > { %s1619_s14 = scalar_select %p1373_p6, 1, 0 }
  0x13   : > { %p1378_p8 = pnand %p898_p5, %p228_p7  ;;  %s43_s17 = sadd.s32 1, %s1262_s30 }
  0x14   : > { %1620 = sst [smem:[#allocation15_spill]] %s1619_s14  ;;  %p37_p11 = scmp.ge.s32.totalorder %s36_s16, 8 }
  0x15   : > { %p1019_p9 = pneg %p1378_p8  ;;  %s1622_s0 = sld [smem:[#allocation17_spill]] }
  0x17   : > { %p1020_p10 = pnand %p1019_p9, %p1358_p1 }
  0x19   : > { %p1123_p13 = pneg %p1020_p10 }
  0x1b   : > { %s1121_s20 = scalar_lea.hbm %s1622_s0, 16 }
  0x1c   : > { %p1122_p12 = scmp.ne.s32.totalorder %s1622_s0, %s1121_s20  ;;  %p1128_p5 = scmp.lt.u32.totalorder %s1121_s20, %s1622_s0 }
  0x1e   : > { %p1124_p0 = pnand %p1123_p13, %p1122_p12 }
  0x20   : > { %p1125_p3 = pneg %p1124_p0 }
  0x22   : > { %p1130_p7 = pnand %p1128_p5, %p1125_p3 }
  0x24   : > { %1133 = shalt.err (!%p1130_p7)
}
  0x25   : > { %s1268_s10 = smov [#allocation5]   ;;  %s1640_s16 = smov (%p37_p11, %s36_s16), 0 }
  0x26   : > { %1022 = dma.hbm_to_smem (!%p1020_p10), %s1622_s0, 16, %s1268_s10, [#allocation8]  }
  0x27   : > { %s1642_s17 = smov (!%p37_p11, %s43_s17), %s1262_s30  ;;  %s71_s18 = sadd.s32 1, %s1246_s26 }
  0x28   : > { %p78_p9 = scmp.ne.s32.totalorder %s1246_s26, %s1242_s25  ;;  %p45_p12 = scmp.ge.s32.totalorder %s1642_s17, 2 }
  0x29   : > { %p79_p13 = scmp.eq.s32.totalorder %s1266_s8, 0  ;;  %p1032_p3 = scmp.lt.s32.totalorder %s1266_s8, 16 }
  0x2a   : > { %p1409_p0 = por %p1362_p2, %p78_p9  ;;  %s1644_s17 = smov (%p45_p12, %s1642_s17), 0 }
  0x2b   : > { %1624 = sst [smem:[#allocation16_spill]] %s1644_s17  ;;  %p80_p5 = por %p79_p13, %p78_p9 }
  0x2c   : > { %s1623_s29 = scalar_select %p1409_p0, 1, 0 }
  0x2d   : > { %s265_s14 = sand.u32 1, %s1246_s26   ;;  %s68_s19 = ssub.s32 %s1262_s30, %s1644_s17 }
  0x2e   : > { %p69_p10 = scmp.eq.s32.totalorder %s68_s19, 0  ;;  %s901_s20 = sshll.u32 %s265_s14, 2 }
  0x2f   : > { %s902_s21 = sshll.u32 %s1262_s30, 6  ;;  %s269_s10 = scalar_lea.vmem [#allocation9], %s901_s20 }
  0x30   : > { %s1421_s22 = scalar_select %p69_p10, %s1246_s26, %s71_s18  }
  0x31   : > { %s1426_s12 = scalar_lea.hbm %s1600_s1, %s902_s21  ;;  %s276_s0 = sshll.u32 %s269_s10, 4  ;;  %s1428_s0 = int_to_ptr.vmem [resolvable:$true] %s276_s0 }
  0x32   : > { %p1432_p2 = pnand %p1032_p3, %p80_p5  ;;  %s266_s18 = scalar_lea.sflag [#allocation6], %s265_s14 }
  0x33   : > { %s1134_s17 = scalar_lea.hbm %s1426_s12, 64  ;;  %s1139_s23 = scalar_lea.hbm %s1600_s1, 128 }
  0x34   : > { %p1135_p11 = scmp.ne.s32.totalorder %s1426_s12, %s1134_s17  ;;  %p1136_p7 = pneg %p1432_p2 }
  0x35   : > { %p1140_p13 = scmp.lt.u32.totalorder %s1426_s12, %s1600_s1  ;;  %p1141_p3 = scmp.lt.u32.totalorder %s1139_s23, %s1134_s17 }
  0x36   : > { %p1137_p9 = pnand %p1136_p7, %p1135_p11  ;;  %p1143_p10 = scmp.lt.u32.totalorder %s1134_s17, %s1426_s12 }
  0x37   : > { %p1142_p5 = por %p1141_p3, %p1140_p13 }
  0x38   : > { %p1138_p12 = pneg %p1137_p9 }
  0x39   : > { %p1144_p6 = por %p1143_p10, %p1142_p5 }
  0x3b   : > { %p1145_p0 = pnand %p1144_p6, %p1138_p12 }
  0x3d   : > { %1148 = shalt.err (!%p1145_p0)
}
  0x3e   : > { %s1149_s14 = scalar_lea.vmem %s1428_s0, 64  ;;  %s1269_s20 = smov [#allocation9]  }
  0x3f   : > { %p1150_p11 = scmp.ne.s32.totalorder %s1428_s0, %s1149_s14  ;;  %s1154_s21 = sshll.u32 %s1269_s20, 4  ;;  %s1155_s21 = int_to_ptr.vmem [resolvable:$false] %s1154_s21 }
  0x40   : > { %s1156_s9 = scalar_lea.vmem %s1155_s21, 128  ;;  %p1157_p1 = scmp.lt.s32.totalorder %s1428_s0, %s1155_s21 }
  0x41   : > { %p1152_p9 = pnand %p1150_p11, %p1136_p7  ;;  %p1158_p13 = scmp.lt.s32.totalorder %s1156_s9, %s1149_s14 }
  0x43   : > { %p1153_p4 = pneg %p1152_p9  ;;  %p1159_p3 = por %p1158_p13, %p1157_p1 }
  0x45   : > { %p1160_p5 = pnand %p1159_p3, %p1153_p4 }
  0x47   : > { %1163 = shalt.err (!%p1160_p5)
}
  0x48   : > { %1026 = dma.hbm_to_vmem [thread:$0]  (!%p1432_p2), %s1426_s12, 64, %s1428_s0, %s266_s18  }
  0x49   : > { %285 = sbr.rel (%p1378_p8) target bundleno = 1334 (0x536), region = 48  ;;  %p1626_p6 = scmp.ne.s32.totalorder (!%p1378_p8), %s1616_s11, 0 }
  0x50   : > { %1225 = dma.done.wait (%p1626_p6), [#allocation8], 16  }
  0x51   : > { %1227 = vsyncadd (%p1626_p6), [#allocation8], 4294967280  ;;  %s1468_s17 = sand.u32 1, %s1242_s25   ;;  %p1627_p1 = scmp.ne.s32.totalorder %s1618_s13, 0 }
  0x52   : > { %s905_s23 = sshll.u32 %s1468_s17, 2  ;;  %s292_s19 = scalar_lea.sflag [#allocation6], %s1468_s17 }
  0x53   : > { %s1472_s10 = scalar_lea.vmem [#allocation9], %s905_s23 }
  0x54   : > { %1229 = dma.done.wait (%p1627_p1), %s292_s19, 64  }
  0x55   : > { %1231 = vsyncadd (%p1627_p1), %s292_s19, 4294967232 }
  0x56   : > { %300 = sfence }
  0x57   : > { %s906_s0 = sshll.u32 %s1468_s17, 3  ;;  %p907_p4 = scmp.ne.s32.totalorder %s1250_s27, 0 }
  0x58   : > { %s1479_s11 = scalar_lea.vmem [#allocation10], %s906_s0  ;;  %vm332_vm0 = vcmask (!%p907_p4), 261120   ;;  %v1270_v0 = vmov (!%p907_p4), 0.0  }
  0x59   : > { %331 = sbr.rel (%p907_p4) target bundleno = 96 (0x60), region = 60  ;;  %333 = vst.msk [vmem:[#allocation4] sm:$0xff] (!%p907_p4), %vm332_vm0, %v1270_v0 }
  0x60 PF: > { %s1483_s15 = sshll.u32 %s1250_s27, 4  ;;  %v1271_v1 = vmov 0.0   ;;  %vm1272_vm1 = vmmov 0   ;;  %v338_v4 = vld [vmem:[%s1472_s10] sm:$0xf]  ;;  %vm358_vm2 = vcmask 261120  }
  0x61   : > { %963 = vmatprep.subr.bf16.mxu0 %v1271_v1  ;;  %s341_s18 = scalar_lea.vmem %s1602_s3, %s1483_s15  ;;  %967 = vmatprep.mubr.msk.bf16.mxu0 %vm1272_vm1, %v1271_v1  ;;  %s485_s21 = scalar_lea.vmem %s1601_s2, %s1483_s15  ;;  %v482_v7 = vld [vmem:[%s1472_s10] sm:$0xf]  ;;  %vm461_vm3 = vcmask 523264   ;;  %vm471_vm4 = vcmask 519168   ;;  %vm624_vm5 = vcmask 1043456   ;;  %vm610_vm6 = vcmask 64512  }
  0x62   : > { %v1103_v2 = vld [vmem:[%s341_s18] sm:$0xff]   ;;  %971 = vmatprep.subr.bf16.mxu1 %v1271_v1  ;;  %975 = vmatprep.mubr.msk.bf16.mxu1 %vm1272_vm1, %v1271_v1  ;;  %v1104_v3 = vld [vmem:[%s341_s18 + $0x8] sm:$0xff]   ;;  %s403_s19 = scalar_lea.vmem %s1603_s4, %s1483_s15  ;;  %s917_s10 = sshll.u32 %s1250_s27, 2 }
  0x63   : > { %964 = vmatpush3.bf16.msra.mxu0 %v1103_v2  ;;  %v1105_v5 = vld [vmem:[%s485_s21] sm:$0xff]   ;;  %v1106_v6 = vld [vmem:[%s485_s21 + $0x8] sm:$0xff]   ;;  %s553_s0 = sld [smem:[#allocation5 + %s1250_s27]]  ;;  %s470_s15 = scalar_lea.vmem [#allocation2], %s917_s10 }
  0x64   : > { %965 = vmatprep.subr.bf16.mxu0 %v1271_v1  ;;  %v1107_v20 = vld [vmem:[%s403_s19] sm:$0xff]   ;;  %v1108_v21 = vld [vmem:[%s403_s19 + $0x8] sm:$0xff]   ;;  %s475_s13 = scalar_lea.vmem [#allocation3], %s917_s10  ;;  %s944_s12 = sshll.u32 %s1250_s27, 5 }
  0x65   : > { %972 = vmatpush3.bf16.msra.mxu1 %v1107_v20  ;;  %s674_s20 = scalar_lea.vmem %s1604_s5, %s944_s12  ;;  %p935_p8 = scmp.ne.s32.totalorder %s1250_s27, 7 }
  0x66   : > { %973 = vmatprep.subr.bf16.mxu1 %v1271_v1  ;;  %v1109_v54 = vld [vmem:[%s674_s20] sm:$0xff]   ;;  %v1110_v55 = vld [vmem:[%s674_s20 + $0x8] sm:$0xff]   ;;  %v1111_v56 = vld [vmem:[%s674_s20 + $0x10] sm:$0xff]  }
  0x67   : > { %966 = vmatpush3.bf16.msra.mxu0 %v1104_v3  ;;  %v1112_v57 = vld [vmem:[%s674_s20 + $0x18] sm:$0xff]   ;;  %v670_v3 = vld [vmem:[#allocation4] sm:$0xff] }
  0x68   : > { %979 = vmatprep.subr.bf16.mxu0 %v1271_v1 }
  0x69   : > { %974 = vmatpush3.bf16.msra.mxu1 %v1108_v21  ;;  %v554_v30 = vstv %s553_s0 }
  0x6a   : > { %968 = vmatmul.mubr.msk.bf16.vlgmr.msra.gmra.mrb[0].mxu0 %vm358_vm2, %v338_v4  ;;  %987 = vmatprep.subr.bf16.mxu1 %v1271_v1 }
  0x6b   : > { %980 = vmatpush3.bf16.msra.mxu0 %v1105_v5  ;;  %983 = vmatprep.mubr.msk.bf16.mxu0 %vm1272_vm1, %v1271_v1 }
  0x6c   : > { %981 = vmatprep.subr.bf16.mxu0 %v1271_v1  ;;  %976 = vmatmul.mubr.msk.bf16.vlgmr.msra.gmra.mrb[0].mxu1 %vm358_vm2, %v338_v4 }
  0x6d   : > { %989 = vmatprep.mubr.msk.bf16.mxu1 %vm1272_vm1, %v1271_v1 }
  0x6f   : > { %982 = vmatpush3.bf16.msra.mxu0 %v1106_v6 }
  0x70   : > { %993 = vmatprep.subr.bf16.mxu0 %v1271_v1 }
  0x72   : > { %984 = vmatmul.mubr.msk.bf16.vlgmr.msra.gmra.mrb[4].mxu0 %vm358_vm2, %v482_v7 }
  0x73   : > { %995 = vmatprep.mubr.msk.bf16.mxu0 %vm1272_vm1, %v1271_v1 }
 0x13d   : > { %v396_v8 = vpop.f32.mrb[0].mxu0 }
 0x13e   : > { %v969_v9 = vpop.f32.mrb[1].mxu0  ;;  %v460_v10 = vmul.f32 %v396_v8, %v396_v8 }
 0x13f   : > { %v399_v11 = vpop.f32.mrb[2].mxu0  ;;  %v454_v36 = vpop.f32.mrb[0].mxu1  ;;  %v936_v9 = vld [vmem:[%s1605_s6] ss:$0 sm:$0xff] (!%p935_p8) }
 0x140   : > { %v970_v12 = vpop.f32.mrb[3].mxu0  ;;  %v462_v13 = vsel %vm461_vm3, %v460_v10, 0.0  ;;  %v473_v37 = vpack.c.bf16 %v454_v36, %v454_v36  ;;  %v977_v38 = vpop.f32.mrb[1].mxu1 }
 0x141   : > { %463 = vadd.xlane.f32.xlu0 %v462_v13  ;;  %v457_v39 = vpop.f32.mrb[2].mxu1 }
 0x142   : > { %476 = vst.msk [vmem:[%s475_s13] sm:$0xf] %vm471_vm4, %v473_v37  ;;  %v978_v40 = vpop.f32.mrb[3].mxu1 }
 0x145   : > { %v540_v14 = vpop.f32.mrb[4].mxu0 }
 0x146   : > { %v546_v15 = vmul.f32 %v540_v14, %v540_v14  ;;  %v985_v16 = vpop.f32.mrb[5].mxu0 }
 0x147   : > { %v543_v17 = vpop.f32.mrb[6].mxu0 }
 0x148   : > { %v548_v18 = vsel %vm461_vm3, %v546_v15, 0.0  ;;  %v986_v19 = vpop.f32.mrb[7].mxu0 }
 0x149   : > { %549 = vadd.xlane.f32.xlu0 %v548_v18  ;;  %v563_v41 = vld [vmem:[%s475_s13] sm:$0xf] }
 0x14a   : > { %v626_v42 = vsel %vm624_vm5, %v563_v41, 0 }
 0x14b   : > { %994 = vmatpush3.bf16.msra.mxu0 %v626_v42 }
 0x1ce   : > { %v464_v22 = vpop.xlane.xlu0 %463 }
 0x1cf   : > { %v465_v23 = vmax.f32 %v464_v22, 1e-24 }
 0x1d1   : > { %1113 = vrsqrt.f32 %v465_v23 }
 0x1d6   : > { %v550_v24 = vpop.xlane.xlu0 %549 }
 0x1d7   : > { %v551_v25 = vmax.f32 %v550_v24, 1e-24 }
 0x1d9   : > { %1115 = vrsqrt.f32 %v551_v25 }
 0x1db   : > { %v1114_v26 = vpop.eup %1113 }
 0x1dc   : > { %v467_v27 = vmul.f32 %v1114_v26, %v396_v8 }
 0x1de   : > { %v468_v28 = vpack.c.bf16 %v467_v27, %v467_v27 }
 0x1e0   : > { %472 = vst.msk [vmem:[%s470_s15] sm:$0xf] %vm471_vm4, %v468_v28 }
 0x1e3   : > { %v1116_v29 = vpop.eup %1115 }
 0x1e4   : > { %v555_v31 = vmul.f32 %v1116_v29, %v554_v30 }
 0x1e6   : > { %v556_v34 = vmul.f32 %v555_v31, %v540_v14 }
 0x1e7   : > { %v560_v32 = vld [vmem:[%s470_s15] sm:$0xf] }
 0x1e8   : > { %v568_v33 = vsel %vm461_vm3, %v560_v32, 0  ;;  %v557_v35 = vpack.c.bf16 %v556_v34, %v556_v34 }
 0x1e9   : > { %988 = vmatpush3.bf16.xpose.msra.mxu1 %v568_v33 }
 0x1ea   : > { %999 = vmatprep.subr.bf16.mxu1 %v1271_v1 }
 0x1f0   : > { %990 = vmatmul.mubr.msk.bf16.vlgmr.msra.gmra.mrb[4].mxu1 %vm461_vm3, %v557_v35 }
 0x1f1   : > { %1007 = vmatprep.mubr.msk.bf16.mxu1 %vm1272_vm1, %v1271_v1  ;;  %1000 = vmatpush3.bf16.msra.mxu1 %v1109_v54 }
 0x1f2   : > { %1001 = vmatprep.subr.bf16.mxu1 %v1271_v1 }
 0x1f5   : > { %1002 = vmatpush3.bf16.msra.mxu1 %v1110_v55 }
 0x1f6   : > { %1003 = vmatprep.subr.bf16.mxu1 %v1271_v1 }
 0x1f9   : > { %1004 = vmatpush3.bf16.msra.mxu1 %v1111_v56 }
 0x1fa   : > { %1005 = vmatprep.subr.bf16.mxu1 %v1271_v1 }
 0x1fd   : > { %1006 = vmatpush3.bf16.msra.mxu1 %v1112_v57 }
 0x2c3   : > { %v604_v43 = vpop.f32.mrb[4].mxu1 }
 0x2c4   : > { %v991_v44 = vpop.f32.mrb[5].mxu1  ;;  %v611_v45 = vsel %vm610_vm6, %v604_v43, -inf }
 0x2c5   : > { %612 = vmax.xlane.f32.xlu1 %v611_v45  ;;  %v607_v46 = vpop.f32.mrb[6].mxu1 }
 0x2c6   : > { %v992_v47 = vpop.f32.mrb[7].mxu1 }
 0x352   : > { %v613_v48 = vpop.xlane.xlu1 %612 }
 0x353   : > { %v614_v49 = vsub.f32 %v604_v43, %v613_v48 }
 0x355   : > { %v615_v50 = vmul.f32 1.442695, %v614_v49 }
 0x357   : > { %1117 = vpow2.f32 %v615_v50 }
 0x361   : > { %v1118_v51 = vpop.eup %1117 }
 0x362   : > { %v617_v52 = vsel %vm610_vm6, %v1118_v51, 0.0  ;;  %v620_v53 = vpack.c.bf16 %v1118_v51, %v1118_v51 }
 0x363   : > { %618 = vadd.xlane.f32.xlu1 %v617_v52 }
 0x364   : > { %996 = vmatmul.mubr.msk.bf16.vlgmr.msra.gmra.mrb[8].mxu0 %vm610_vm6, %v620_v53 }
 0x3f0   : > { %v619_v58 = vpop.xlane.xlu1 %618 }
 0x3f1   : > { %1119 = vrcp.f32 %v619_v58 }
 0x3fb   : > { %v1120_v59 = vpop.eup %1119 }
 0x437   : > { %v662_v60 = vpop.f32.mrb[8].mxu0 }
 0x438   : > { %v669_v61 = vmul.f32 %v1120_v59, %v662_v60  ;;  %v997_v62 = vpop.f32.mrb[9].mxu0 }
 0x439   : > { %v665_v63 = vpop.f32.mrb[10].mxu0 }
 0x43a   : > { %v671_v0 = vpack.c.bf16 %v669_v61, %v669_v61  ;;  %v998_v2 = vpop.f32.mrb[11].mxu0 }
 0x43c   : > { %1008 = vmatmul.mubr.msk.bf16.vlgmr.msra.gmra.mrb[8].mxu1 %vm461_vm3, %v671_v0 }
 0x50c   : > { %755 = sbr.rel (%p935_p8) target bundleno = 1309 (0x51d), region = 68 }
 0x50f   : > { %v744_v4 = vpop.f32.mrb[8].mxu1 }
 0x510   : > { %v750_v5 = vadd.f32 %v744_v4, %v670_v3  ;;  %v1009_v6 = vpop.f32.mrb[9].mxu1 }
 0x511   : > { %v747_v7 = vpop.f32.mrb[10].mxu1 }
 0x512   : > { %751 = vst.msk [vmem:[#allocation4] sm:$0xff] %vm358_vm2, %v750_v5  ;;  %v1010_v1 = vpop.f32.mrb[11].mxu1 }
 0x519   : > { %v756_v8 = vld [vmem:[#allocation4] sm:$0xff] }
 0x51a   : > { %v764_v10 = vadd.f32 %v936_v9, %v756_v8 }
 0x51c   : > { %765 = vst.msk [vmem:[%s1479_s11] sm:$0xff] %vm358_vm2, %v764_v10 }
 0x51d PF: > { %s938_s23 = sshll.u32 %s1254_s28, 7  ;;  %s781_s0 = sshll.u32 %s1479_s11, 4  ;;  %s782_s0 = int_to_ptr.vmem [resolvable:$true] %s781_s0 }
 0x51e   : > { %s1550_s27 = scalar_lea.hbm %s1606_s7, %s938_s23  ;;  %s767_s15 = scalar_lea.sflag [#allocation7], %s1468_s17 }
 0x51f   : > { %s1164_s13 = scalar_lea.vmem %s782_s0, 128  ;;  %p1628_p2 = scmp.ne.s32.totalorder %s1623_s29, 0 }
 0x520   : > { %p1165_p0 = scmp.ne.s32.totalorder %s782_s0, %s1164_s13  ;;  %s1273_s12 = smov [#allocation10]  }
 0x521   : > { %s1168_s18 = sshll.u32 %s1273_s12, 4  ;;  %s1169_s18 = int_to_ptr.vmem [resolvable:$false] %s1168_s18 }
 0x522   : > { %p1166_p7 = pnand %p1165_p0, %p1628_p2  ;;  %s1170_s14 = scalar_lea.vmem %s1169_s18, 256 }
 0x523   : > { %p1171_p10 = scmp.lt.s32.totalorder %s782_s0, %s1169_s18  ;;  %p1172_p11 = scmp.lt.s32.totalorder %s1170_s14, %s1164_s13 }
 0x524   : > { %p1167_p12 = pneg %p1166_p7 }
 0x525   : > { %p1173_p9 = por %p1172_p11, %p1171_p10 }
 0x527   : > { %p1174_p13 = pnand %p1173_p9, %p1167_p12 }
 0x529   : > { %1177 = shalt.err (!%p1174_p13)
}
 0x52a   : > { %s1178_s28 = scalar_lea.hbm %s1550_s27, 128  ;;  %s1182_s20 = scalar_lea.hbm %s1606_s7, 256 }
 0x52b   : > { %p1179_p3 = scmp.ne.s32.totalorder %s1550_s27, %s1178_s28  ;;  %p1183_p1 = scmp.lt.u32.totalorder %s1550_s27, %s1606_s7 }
 0x52c   : > { %p1184_p4 = scmp.lt.u32.totalorder %s1182_s20, %s1178_s28  ;;  %p1186_p0 = scmp.lt.u32.totalorder %s1178_s28, %s1550_s27 }
 0x52d   : > { %p1180_p5 = pnand %p1179_p3, %p1628_p2 }
 0x52e   : > { %p1185_p8 = por %p1184_p4, %p1183_p1 }
 0x52f   : > { %p1181_p6 = pneg %p1180_p5 }
 0x530   : > { %p1187_p7 = por %p1186_p0, %p1185_p8 }
 0x532   : > { %p1188_p12 = pnand %p1187_p7, %p1181_p6 }
 0x534   : > { %1191 = shalt.err (!%p1188_p12)
}
 0x535   : > { %1017 = dma.vmem_to_hbm [thread:$0]  (%p1628_p2), %s782_s0, 128, %s1550_s27, %s767_s15  }
 0x536 PF: > { %s1629_s23 = sld [smem:[#allocation15_spill]]  ;;  %p1034_p10 = scmp.ge.s32.totalorder %s1266_s8, 2 }
 0x537   : > { %s793_s19 = sand.u32 1, %s1238_s24  }
 0x538   : > { %s794_s10 = scalar_lea.sflag [#allocation7], %s793_s19 }
 0x53c   : > { %p1630_p11 = scmp.ne.s32.totalorder %s1629_s23, 0 }
 0x53e   : > { %p1028_p9 = pnand %p1034_p10, %p1630_p11 }
 0x540   : > { %1233 = dma.done.wait (!%p1028_p9), %s794_s10, 128  }
 0x541   : > { %1235 = vsyncadd (!%p1028_p9), %s794_s10, 4294967168  ;;  %s24_s8 = sadd.s32 1, %s1266_s8   ;;  %s1631_s27 = sld [smem:[#allocation14_spill]] }
 0x542   : > { %p21_p13 = scmp.ge.s32.totalorder %s24_s8, 18   ;;  %s1632_s0 = sld [smem:[#allocation16_spill]] }
 0x543   : > { %s1633_s24 = smov %s1242_s25  ;;  %s1634_s25 = smov %s1246_s26 }
 0x544   : > { %s1635_s26 = smov %s1421_s22  ;;  %s1636_s28 = smov %s1262_s30 }
 0x545   : > { %s1637_s29 = smov %s1640_s16  ;;  %23 = sbr.rel (!%p21_p13) target bundleno = 10 (0xa), region = 119 }
 0x548   : > { %s1638_s30 = smov %s1632_s0 }
 0x54c   :  { %799 = vsyncpa [#allocation6], 1 }
 0x54d   :  { %801 = vsyncpa [#allocation6 + $0x1], 1 }
 0x54e   :  { %802 = vsyncpa [#allocation7], 1 }
 0x54f   :  { %804 = vsyncpa [#allocation7 + $0x1], 1 }
 0x550   :  { %805 = vsyncpa [#allocation8], 1 }
 0x551   :  { %807 = vsyncpa [#allocation8 + $0x1], 1 }

</bundles_post_ra>
